<compile_context>
chip_gen: v7x
topology: tpu7x:2x2x1
jax: 0.10.0
libtpu: 0.0.40
codegen_flags: <defaults>
</compile_context>

<pallas_src>
import functools
import math

import jax
import jax.numpy as jnp
from jax.experimental import pallas as pl
from jax.experimental.pallas import tpu as pltpu


def policy_kernel(s_ref, w1_ref, w2_ref, wh_ref, b_ref, out_ref, *,
                  action_dim, head_rows):
    # Stacked biases (f32): col 0 -> b1, col 1 -> b2, col 2 -> fused head bias.
    b1 = b_ref[:, 0:1]                     # (hidden, 1)
    b2 = b_ref[:, 1:2]                     # (hidden, 1)
    bh = b_ref[0:head_rows, 2:3]           # (head_rows, 1)

    # Batch-in-lanes: everything is transposed, batch on the lane axis.
    s = s_ref[...].astype(jnp.bfloat16)    # (obs_dim, tb)

    # shared layer + (eval-mode) dropout + relu       h1^T = W1^T @ s^T
    h1 = jnp.dot(w1_ref[...], s, preferred_element_type=jnp.float32) + b1
    h1 = jnp.maximum(h1, 0.0)              # (hidden, tb) f32

    # second hidden layer + relu                       h2^T = W2^T @ h1^T
    h2 = jnp.dot(w2_ref[...], h1.astype(jnp.bfloat16),
                 preferred_element_type=jnp.float32) + b2
    h2 = jnp.maximum(h2, 0.0)              # (hidden, tb) f32

    # fused action/value head: rows [0, A) = logits, row A = value, rest = 0.
    head = jnp.dot(wh_ref[...], h2.astype(jnp.bfloat16),
                   preferred_element_type=jnp.float32) + bh   # (head_rows, tb)

    # softmax over the first `action_dim` rows (sublane axis), exact normalization.
    row = jax.lax.broadcasted_iota(jnp.int32, head.shape, 0)
    logits = jnp.where(row < action_dim, head, -jnp.inf)
    m = jnp.max(logits, axis=0, keepdims=True)
    e = jnp.exp(logits - m)                                   # masked rows -> 0
    denom = jnp.sum(e, axis=0, keepdims=True)
    probs = e / denom                                         # exact (no approx recip)

    # output slab rows: [probs_0 .. probs_{A-1} | value | zeros]
    out_ref[...] = jnp.where(row == action_dim, head, probs)


def _cdiv(a, b):
    return -(-a // b)


def _round_up(x, m):
    return _cdiv(x, m) * m


def policy_forward(state, params, *, block_b=1024):
    """state: (B, obs_dim) f32 -> (action_prob (B, A), state_value (B, 1))."""
    w1, b1, w2, b2, wa, ba, wv, bv = params
    obs_dim, hidden = w1.shape
    A = wa.shape[1]
    B = state.shape[0]

    # Fused head: rows [0, A) = action weights, row A = value weights, rest zero.
    head_rows = max(8, _round_up(A + 1, 8))
    assert A + 1 <= head_rows and head_rows <= hidden

    # Pre-cast MXU operands to bf16 (accumulation stays f32 inside the kernel).
    w1t = w1.T.astype(jnp.bfloat16)                              # (hidden, obs_dim)
    w2t = w2.T.astype(jnp.bfloat16)                              # (hidden, hidden)
    wht = jnp.zeros((head_rows, hidden), jnp.float32)
    wht = wht.at[:A, :].set(wa.T).at[A, :].set(wv[:, 0])
    wht = wht.astype(jnp.bfloat16)                               # (head_rows, hidden)

    # Stack biases (f32) into a single (hidden, 3) array -> one resident DMA.
    bh_col = jnp.zeros((hidden, 1), jnp.float32)
    bh_col = bh_col.at[:A, 0].set(ba[0]).at[A, 0].set(bv[0, 0])
    biases = jnp.concatenate([b1.T, b2.T, bh_col], axis=1)       # (hidden, 3)

    # Batch on the lane axis.
    state_t = state.T                                            # (obs_dim, B)

    # Batch tile: big tiles to amortize per-step overhead, but >= 2 grid steps
    # whenever B allows so both v7x TensorCores are used.
    if B < 256:
        tb = B                       # single lane block == full batch dim (allowed)
    else:
        tb = min(block_b, _round_up(_cdiv(B, 2), 128))
    grid = (pl.cdiv(B, tb),)

    out = pl.pallas_call(
        functools.partial(policy_kernel, action_dim=A, head_rows=head_rows),
        out_shape=jax.ShapeDtypeStruct((head_rows, B), jnp.float32),
        grid_spec=pltpu.PrefetchScalarGridSpec(
            num_scalar_prefetch=0,
            grid=grid,
            in_specs=[
                pl.BlockSpec((obs_dim, tb), lambda i: (0, i)),        # state^T tile
                pl.BlockSpec((hidden, obs_dim), lambda i: (0, 0)),    # W1^T (resident)
                pl.BlockSpec((hidden, hidden), lambda i: (0, 0)),     # W2^T (resident)
                pl.BlockSpec((head_rows, hidden), lambda i: (0, 0)),  # fused head W^T
                pl.BlockSpec((hidden, 3), lambda i: (0, 0)),          # stacked biases
            ],
            out_specs=pl.BlockSpec((head_rows, tb), lambda i: (0, i)),
        ),
        compiler_params=pltpu.CompilerParams(
            dimension_semantics=("parallel",),
        ),
    )(state_t, w1t, w2t, wht, biases)

    probs = out[:A, :].T                 # (B, A)
    value = out[A:A + 1, :].T            # (B, 1)
    return probs, value


def xavier_uniform(key, fan_in, fan_out):
    bound = math.sqrt(6.0 / (fan_in + fan_out))
    # Stored already transposed relative to nn.Linear: (in_features, out_features).
    return jax.random.uniform(key, (fan_in, fan_out), jnp.float32, -bound, bound)


def init_policy_params(key, obs_dim, hidden, action_dim):
    k1, k2, k3, k4 = jax.random.split(key, 4)
    w1 = xavier_uniform(k1, obs_dim, hidden)
    b1 = jnp.full((1, hidden), 0.01, jnp.float32)
    w2 = xavier_uniform(k2, hidden, hidden)
    b2 = jnp.full((1, hidden), 0.01, jnp.float32)
    wa = xavier_uniform(k3, hidden, action_dim)
    ba = jnp.full((1, action_dim), 0.01, jnp.float32)
    wv = xavier_uniform(k4, hidden, 1)
    bv = jnp.full((1, 1), 0.01, jnp.float32)
    return (w1, b1, w2, b2, wa, ba, wv, bv)


def reference_forward(state, params):
    """Full-f32 reference."""
    w1, b1, w2, b2, wa, ba, wv, bv = params
    h1 = jnp.maximum(state @ w1 + b1, 0.0)
    h2 = jnp.maximum(h1 @ w2 + b2, 0.0)
    probs = jax.nn.softmax(h2 @ wa + ba, axis=-1)
    value = h2 @ wv + bv
    return probs, value


def reference_forward_bf16(state, params):
    """Reference using the same precision recipe as the kernel (bf16 MXU, f32 acc)."""
    w1, b1, w2, b2, wa, ba, wv, bv = params
    bf = jnp.bfloat16
    h1 = jnp.maximum(jnp.dot(state.astype(bf), w1.astype(bf),
                             preferred_element_type=jnp.float32) + b1, 0.0)
    h2 = jnp.maximum(jnp.dot(h1.astype(bf), w2.astype(bf),
                             preferred_element_type=jnp.float32) + b2, 0.0)
    logits = jnp.dot(h2.astype(bf), wa.astype(bf),
                     preferred_element_type=jnp.float32) + ba
    probs = jax.nn.softmax(logits, axis=-1)
    value = jnp.dot(h2.astype(bf), wv.astype(bf),
                    preferred_element_type=jnp.float32) + bv
    return probs, value


if __name__ == "__main__":
    # CartPole-like dims: obs_dim=4, discrete action_dim=2, hidden=128 (as in module).
    # batch=256 -> two 128-wide lane tiles (exercises the multi-step, 2-core grid).
    obs_dim, hidden, action_dim, batch = 4, 128, 2, 256

    key = jax.random.PRNGKey(0)
    k_params, k_state = jax.random.split(key)
    params = init_policy_params(k_params, obs_dim, hidden, action_dim)
    state = jax.random.normal(k_state, (batch, obs_dim), jnp.float32)

    probs, value = policy_forward(state, params)
    jax.block_until_ready((probs, value))

    assert probs.shape == (batch, action_dim)
    assert value.shape == (batch, 1)

    # Kernel math vs. a reference that uses the same bf16-operand/f32-accumulate
    # matmul recipe (tight tolerance).
    bf_probs, bf_value = reference_forward_bf16(state, params)
    assert jnp.allclose(probs, bf_probs, atol=5e-3, rtol=5e-3)
    assert jnp.allclose(value, bf_value, atol=5e-3, rtol=5e-3)

    # End-to-end vs. the full-f32 reference (looser: bf16 MXU operands).
    ref_probs, ref_value = reference_forward(state, params)
    assert jnp.allclose(probs, ref_probs, atol=5e-2, rtol=5e-2)
    assert jnp.allclose(value, ref_value, atol=5e-2, rtol=5e-2)

    # Exact softmax normalization (plain divide, no approximate reciprocal).
    assert jnp.allclose(jnp.sum(probs, axis=-1), 1.0, atol=1e-5)

    print("KERNEL_OK")
</pallas_src>

<mosaic_0001>
module attributes {stable_mosaic.version = 11 : i64} {
  func.func @policy_kernel(%arg0: i32, %arg1: memref<4x128xf32, #tpu.memory_space<vmem>>, %arg2: memref<128x4xbf16, #tpu.memory_space<vmem>>, %arg3: memref<128x128xbf16, #tpu.memory_space<vmem>>, %arg4: memref<8x128xbf16, #tpu.memory_space<vmem>>, %arg5: memref<128x3xf32, #tpu.memory_space<vmem>>, %arg6: memref<8x128xf32, #tpu.memory_space<vmem>>) attributes {dimension_semantics = [#tpu.dimension_semantics<parallel>], iteration_bounds = array<i64: 2>, scalar_prefetch = 0 : i64, scratch_operands = 0 : i64, tpu.core_type = #tpu.core_type<tc>, window_params = [{transform_indices = @transform_0, window_bounds = array<i64: 4, 128>}, {pipeline_mode = #tpu.pipeline_mode<synchronous>, transform_indices = @transform_1, window_bounds = array<i64: 128, 4>}, {pipeline_mode = #tpu.pipeline_mode<synchronous>, transform_indices = @transform_2, window_bounds = array<i64: 128, 128>}, {pipeline_mode = #tpu.pipeline_mode<synchronous>, transform_indices = @transform_3, window_bounds = array<i64: 8, 128>}, {pipeline_mode = #tpu.pipeline_mode<synchronous>, transform_indices = @transform_4, window_bounds = array<i64: 128, 3>}, {transform_indices = @transform_5, window_bounds = array<i64: 8, 128>}]} {
    %c0 = arith.constant 0 : index
    %c0_0 = arith.constant 0 : index
    %0 = vector.load %arg5[%c0, %c0_0] : memref<128x3xf32, #tpu.memory_space<vmem>>, vector<128x1xf32>
    %c0_1 = arith.constant 0 : index
    %c1 = arith.constant 1 : index
    %1 = vector.load %arg5[%c0_1, %c1] : memref<128x3xf32, #tpu.memory_space<vmem>>, vector<128x1xf32>
    %c0_2 = arith.constant 0 : index
    %c2 = arith.constant 2 : index
    %2 = vector.load %arg5[%c0_2, %c2] : memref<128x3xf32, #tpu.memory_space<vmem>>, vector<8x1xf32>
    %c0_3 = arith.constant 0 : index
    %c0_4 = arith.constant 0 : index
    %3 = vector.load %arg1[%c0_3, %c0_4] : memref<4x128xf32, #tpu.memory_space<vmem>>, vector<4x128xf32>
    %4 = arith.truncf %3 : vector<4x128xf32> to vector<4x128xbf16>
    %c0_5 = arith.constant 0 : index
    %c0_6 = arith.constant 0 : index
    %5 = vector.load %arg2[%c0_5, %c0_6] : memref<128x4xbf16, #tpu.memory_space<vmem>>, vector<128x4xbf16>
    %cst = arith.constant dense<0.000000e+00> : vector<128x128xf32>
    %6 = tpu.matmul %5, %4, %cst {dimension_numbers = #tpu.dot_dimension_numbers<[1], [0], [0], [1], [0, 0, 1, 1], [], []>} : vector<128x4xbf16>, vector<4x128xbf16>, vector<128x128xf32> -> vector<128x128xf32>
    %7 = vector.broadcast %0 : vector<128x1xf32> to vector<128x128xf32>
    %8 = arith.addf %6, %7 : vector<128x128xf32>
    %cst_7 = arith.constant 0.000000e+00 : f32
    %9 = vector.broadcast %cst_7 : f32 to vector<128x128xf32>
    %10 = arith.maximumf %8, %9 : vector<128x128xf32>
    %c0_8 = arith.constant 0 : index
    %c0_9 = arith.constant 0 : index
    %11 = vector.load %arg3[%c0_8, %c0_9] : memref<128x128xbf16, #tpu.memory_space<vmem>>, vector<128x128xbf16>
    %12 = arith.truncf %10 : vector<128x128xf32> to vector<128x128xbf16>
    %cst_10 = arith.constant dense<0.000000e+00> : vector<128x128xf32>
    %13 = tpu.matmul %11, %12, %cst_10 {dimension_numbers = #tpu.dot_dimension_numbers<[1], [0], [0], [1], [0, 0, 1, 1], [], []>} : vector<128x128xbf16>, vector<128x128xbf16>, vector<128x128xf32> -> vector<128x128xf32>
    %14 = vector.broadcast %1 : vector<128x1xf32> to vector<128x128xf32>
    %15 = arith.addf %13, %14 : vector<128x128xf32>
    %cst_11 = arith.constant 0.000000e+00 : f32
    %16 = vector.broadcast %cst_11 : f32 to vector<128x128xf32>
    %17 = arith.maximumf %15, %16 : vector<128x128xf32>
    %c0_12 = arith.constant 0 : index
    %c0_13 = arith.constant 0 : index
    %18 = vector.load %arg4[%c0_12, %c0_13] : memref<8x128xbf16, #tpu.memory_space<vmem>>, vector<8x128xbf16>
    %19 = arith.truncf %17 : vector<128x128xf32> to vector<128x128xbf16>
    %cst_14 = arith.constant dense<0.000000e+00> : vector<8x128xf32>
    %20 = tpu.matmul %18, %19, %cst_14 {dimension_numbers = #tpu.dot_dimension_numbers<[1], [0], [0], [1], [0, 0, 1, 1], [], []>} : vector<8x128xbf16>, vector<128x128xbf16>, vector<8x128xf32> -> vector<8x128xf32>
    %21 = vector.broadcast %2 : vector<8x1xf32> to vector<8x128xf32>
    %22 = arith.addf %20, %21 : vector<8x128xf32>
    %23 = tpu.iota {dimensions = array<i32: 0>} : vector<8x128xi32>
    %c2_i32 = arith.constant 2 : i32
    %24 = vector.broadcast %c2_i32 : i32 to vector<8x128xi32>
    %25 = arith.cmpi slt, %23, %24 : vector<8x128xi32>
    %cst_15 = arith.constant 0xFF800000 : f32
    %26 = vector.broadcast %cst_15 : f32 to vector<8x128xf32>
    %27 = arith.select %25, %22, %26 : vector<8x128xi1>, vector<8x128xf32>
    %cst_16 = arith.constant dense<0xFF800000> : vector<128xf32>
    %28 = vector.multi_reduction <maximumf>, %27, %cst_16 [0] : vector<8x128xf32> to vector<128xf32>
    %29 = vector.shape_cast %28 : vector<128xf32> to vector<1x128xf32>
    %30 = vector.broadcast %29 : vector<1x128xf32> to vector<8x128xf32>
    %31 = arith.subf %27, %30 : vector<8x128xf32>
    %32 = math.exp %31 : vector<8x128xf32>
    %cst_17 = arith.constant dense<0.000000e+00> : vector<128xf32>
    %33 = vector.multi_reduction <add>, %32, %cst_17 [0] : vector<8x128xf32> to vector<128xf32>
    %34 = vector.shape_cast %33 : vector<128xf32> to vector<1x128xf32>
    %35 = vector.broadcast %34 : vector<1x128xf32> to vector<8x128xf32>
    %36 = arith.divf %32, %35 : vector<8x128xf32>
    %c2_i32_18 = arith.constant 2 : i32
    %37 = vector.broadcast %c2_i32_18 : i32 to vector<8x128xi32>
    %38 = arith.cmpi eq, %23, %37 : vector<8x128xi32>
    %39 = arith.select %38, %22, %36 : vector<8x128xi1>, vector<8x128xf32>
    %c0_19 = arith.constant 0 : index
    %c0_20 = arith.constant 0 : index
    %40 = vector.load %arg6[%c0_19, %c0_20] : memref<8x128xf32, #tpu.memory_space<vmem>>, vector<8x128xf32>
    tpu.vector_store %arg6[%c0_19, %c0_20], %39 {strides = array<i32>} : memref<8x128xf32, #tpu.memory_space<vmem>>, vector<8x128xf32>,
    return
  }
  func.func @transform_0(%arg0: i32) -> (i32, i32) {
    %c0_i32 = arith.constant 0 : i32
    %c0_i32_0 = arith.constant 0 : i32
    return %c0_i32, %arg0 : i32, i32
  }
  func.func @transform_1(%arg0: i32) -> (i32, i32) {
    %c0_i32 = arith.constant 0 : i32
    %c0_i32_0 = arith.constant 0 : i32
    %c0_i32_1 = arith.constant 0 : i32
    return %c0_i32, %c0_i32_0 : i32, i32
  }
  func.func @transform_2(%arg0: i32) -> (i32, i32) {
    %c0_i32 = arith.constant 0 : i32
    %c0_i32_0 = arith.constant 0 : i32
    %c0_i32_1 = arith.constant 0 : i32
    return %c0_i32, %c0_i32_0 : i32, i32
  }
  func.func @transform_3(%arg0: i32) -> (i32, i32) {
    %c0_i32 = arith.constant 0 : i32
    %c0_i32_0 = arith.constant 0 : i32
    %c0_i32_1 = arith.constant 0 : i32
    return %c0_i32, %c0_i32_0 : i32, i32
  }
  func.func @transform_4(%arg0: i32) -> (i32, i32) {
    %c0_i32 = arith.constant 0 : i32
    %c0_i32_0 = arith.constant 0 : i32
    %c0_i32_1 = arith.constant 0 : i32
    return %c0_i32, %c0_i32_0 : i32, i32
  }
  func.func @transform_5(%arg0: i32) -> (i32, i32) {
    %c0_i32 = arith.constant 0 : i32
    %c0_i32_0 = arith.constant 0 : i32
    return %c0_i32, %arg0 : i32, i32
  }
}

</mosaic_0001>

<bundles_post_ra>
// kernel: tpu_custom_call.1
= control target key start
LH: loop header
LB: loop body
LE: loop exit
PB: predicated region body
PF: predicated region fallthrough
CT: control target
= control target key end

     0   :  { %10 = vsyncpa [#allocation3], 0  ;;  %s1446_s0 = inlined_call_operand.vmem [shape: f32[4,256], index: 0, kind: input, shape index: {}]   ;;  %s1447_s1 = inlined_call_operand.vmem [shape: bf16[128,4], index: 1, kind: input, shape index: {}]   ;;  %s1448_s2 = inlined_call_operand.vmem [shape: bf16[128,128], index: 2, kind: input, shape index: {}]   ;;  %s1449_s3 = inlined_call_operand.vmem [shape: bf16[8,128], index: 3, kind: input, shape index: {}]   ;;  %s1450_s4 = inlined_call_operand.vmem [shape: f32[128,3], index: 4, kind: input, shape index: {}]   ;;  %s1451_s5 = inlined_call_operand.hbm [shape: f32[8,256], index: 5, kind: output, shape index: {}]  }
   0x1   :  { %12 = vsyncpa [#allocation3 + $0x1], 0  ;;  %s1225_s18 = smov 0   ;;  %s1227_s19 = smov 0  }
   0x2   :  { %s1229_s20 = smov 0   ;;  %s1231_s21 = smov 0  }
   0x3 LB: > { %s1246_s22 = sadd.s32 4294967295, %s1187_s21   ;;  %s916_s23 = sadd.s32 4294967294, %s1187_s21   ;;  %s1187_s21 = sphi %s1231_s21, %s1457_s21   ;;  %s1183_s20 = sphi %s1229_s20, %s1456_s20   ;;  %s1179_s19 = sphi %s1227_s19, %s1455_s19   ;;  %s1175_s18 = sphi %s1225_s18, %s1454_s18  }
   0x4   : > { %s1250_s24 = sadd.s32 1, %s1187_s21   ;;  %s135_s25 = sadd.s32 1, %s1183_s20 }
   0x5   : > { %s132_s26 = ssub.s32 %s1187_s21, %s1250_s24  ;;  %p145_p0 = scmp.ne.s32.totalorder %s1183_s20, %s1179_s19 }
   0x6   : > { %p133_p1 = scmp.eq.s32.totalorder %s132_s26, 0  ;;  %p146_p2 = scmp.eq.s32.totalorder %s1246_s22, 1 }
   0x7   : > { %p151_p3 = scmp.ne.s32.totalorder %s1179_s19, %s1175_s18  ;;  %p152_p4 = scmp.eq.s32.totalorder %s916_s23, 1 }
   0x8   : > { %s1261_s27 = scalar_select %p133_p1, %s1183_s20, %s135_s25  }
   0x9   : > { %p1263_p5 = por %p146_p2, %p145_p0  ;;  %p1267_p6 = por %p152_p4, %p151_p3 }
   0xa   : > { %p919_p7 = scmp.ge.s32.totalorder %s1187_s21, 1  ;;  %p189_p8 = scmp.lt.s32.totalorder %s1187_s21, 3 }
   0xc   : > { %p190_p9 = pnand %p919_p7, %p189_p8 }
   0xd   : > { %p216_p10 = scmp.lt.s32.totalorder (!%p190_p9), %s1246_s22, 1  ;;  %v1105_v0 = vld [vmem:[%s1447_s1] sm:$0xff] (!%p190_p9)   ;;  %vm375_vm0 = vcmask (!%p190_p9), 31744   ;;  %v1189_v1 = vmov (!%p190_p9), 0   ;;  %vm400_vm1 = vcmask (!%p190_p9), 1041408   ;;  %v1106_v6 = vld [vmem:[%s1447_s1 + $0x8] sm:$0xff] (!%p190_p9)  }
   0xe   : > { %193 = sbr.rel (%p190_p9) target bundleno = 819 (0x333), region = 40  ;;  %986 = vmatprep.mubr.msk.bf16.mxu0 (!%p190_p9), %vm375_vm0, %v1105_v0  ;;  %1099 = vset.pattern.permute.xlu0 (!%p190_p9), %v1189_v1  ;;  %v1285_v4 = vld [vmem:[%s1450_s4] sm:$0xff] (!%p190_p9)  ;;  %v223_v7 = vld [vmem:[%s1450_s4 + $0x10] sm:$0xff] (!%p190_p9)  ;;  %v222_v9 = vld [vmem:[%s1450_s4 + $0x8] sm:$0xff] (!%p190_p9)  ;;  %v1190_v29 = vmov (!%p190_p9), 1   ;;  %vm1192_vm2 = vmmov (!%p190_p9), 0  }
   0xf   : > { %1100 = vset.pattern.permute.xlu1 (!%p190_p9), %v1189_v1  ;;  %257 = vperm.xlu0 (!%p190_p9), %1099, %v1285_v4   ;;  %v1107_v8 = vld [vmem:[%s1447_s1 + $0x10] sm:$0xff] (!%p190_p9)   ;;  %v224_v10 = vld [vmem:[%s1450_s4 + $0x18] sm:$0xff] (!%p190_p9)  ;;  %v225_v11 = vld [vmem:[%s1450_s4 + $0x20] sm:$0xff] (!%p190_p9)  ;;  %s213_s12 = sand.u32 (!%p190_p9), 1, %s1179_s19   ;;  %s947_s14 = sshll.u32 (!%p190_p9), %s1246_s22, 7 }
  0x10   : > { %267 = vperm.xlu1 (!%p190_p9), %1100, %v223_v7   ;;  %v226_v12 = vld [vmem:[%s1450_s4 + $0x28] sm:$0xff] (!%p190_p9)  ;;  %v1108_v13 = vld [vmem:[%s1447_s1 + $0x18] sm:$0xff] (!%p190_p9)   ;;  %v1109_v14 = vld [vmem:[%s1447_s1 + $0x20] sm:$0xff] (!%p190_p9)   ;;  %s920_s13 = sshll.u32 (!%p190_p9), %s213_s12, 3  ;;  %s1404_s25 = scalar_lea.hbm (!%p190_p9), %s1451_s5, %s947_s14 }
  0x11   : > { %v227_v15 = vld [vmem:[%s1450_s4 + $0x30] sm:$0xff] (!%p190_p9)  ;;  %v228_v16 = vld [vmem:[%s1450_s4 + $0x38] sm:$0xff] (!%p190_p9)  ;;  %v229_v17 = vld [vmem:[%s1450_s4 + $0x40] sm:$0xff] (!%p190_p9)  ;;  %s215_s15 = scalar_lea.vmem (!%p190_p9), [#allocation2], %s920_s13  ;;  %s844_s26 = scalar_lea.sflag (!%p190_p9), [#allocation3], %s213_s12 }
  0x12   : > { %v230_v18 = vld [vmem:[%s1450_s4 + $0x48] sm:$0xff] (!%p190_p9)  ;;  %v1111_v20 = vld [vmem:[%s1447_s1 + $0x30] sm:$0xff] (!%p190_p9)   ;;  %v232_v22 = vld [vmem:[%s1450_s4 + $0x58] sm:$0xff] (!%p190_p9)  ;;  %s857_s16 = sshll.u32 (!%p190_p9), %s215_s15, 4  ;;  %s1406_s16 = int_to_ptr.vmem [resolvable:$true] %s857_s16 }
  0x13   : > { %262 = vperm.xlu0 (!%p190_p9), %1099, %v222_v9   ;;  %v1110_v19 = vld [vmem:[%s1447_s1 + $0x28] sm:$0xff] (!%p190_p9)   ;;  %v231_v21 = vld [vmem:[%s1450_s4 + $0x50] sm:$0xff] (!%p190_p9)  ;;  %v233_v23 = vld [vmem:[%s1450_s4 + $0x60] sm:$0xff] (!%p190_p9)  ;;  %s1125_s30 = scalar_lea.vmem (!%p190_p9), %s1406_s16, 128 }
  0x14   : > { %272 = vperm.xlu1 (!%p190_p9), %1100, %v224_v10   ;;  %v234_v24 = vld [vmem:[%s1450_s4 + $0x68] sm:$0xff] (!%p190_p9)  ;;  %v1112_v25 = vld [vmem:[%s1447_s1 + $0x38] sm:$0xff] (!%p190_p9)   ;;  %v235_v26 = vld [vmem:[%s1450_s4 + $0x70] sm:$0xff] (!%p190_p9)  ;;  %p1126_p11 = scmp.ne.s32.totalorder (!%p190_p9), %s1406_s16, %s1125_s30 }
  0x15   : > { %s217_s7 = scalar_select %p216_p10, %s1246_s22, 1  ;;  %v236_v27 = vld [vmem:[%s1450_s4 + $0x78] sm:$0xff]  ;;  %v1113_v28 = vld [vmem:[%s1448_s2] sm:$0xff]  }
  0x16   : > { %1018 = vmatprep.mubr.bf16.mxu1 %v1113_v28  ;;  %p1127_p12 = pnand %p1126_p11, %p1263_p5  ;;  %s1194_s22 = smov [#allocation2]  }
  0x17   : > { %s921_s8 = sshll.u32 %s217_s7, 2  ;;  %277 = vperm.xlu0 %1099, %v225_v11   ;;  %s1129_s6 = sshll.u32 %s1194_s22, 4  ;;  %s1130_s6 = int_to_ptr.vmem [resolvable:$false] %s1129_s6 }
  0x18   : > { %s219_s11 = scalar_lea.vmem %s1446_s0, %s921_s8  ;;  %282 = vperm.xlu1 %1100, %v226_v12   ;;  %p1128_p13 = pneg %p1127_p12 }
  0x19   : > { %v237_v2 = vld [vmem:[%s219_s11] sm:$0xf]  ;;  %s1131_s7 = scalar_lea.vmem %s1130_s6, 256  ;;  %p1132_p0 = scmp.lt.s32.totalorder %s1406_s16, %s1130_s6 }
  0x1a   : > { %v238_v3 = vpack.c.bf16 %v237_v2, %v237_v2  ;;  %p1133_p1 = scmp.lt.s32.totalorder %s1131_s7, %s1125_s30 }
  0x1b   : > { %287 = vperm.xlu0 %1099, %v227_v15  }
  0x1c   : > { %1054 = vmatprep.subr.msk.bf16.mxu0 %vm400_vm1, %v238_v3  ;;  %v402_v5 = vsel %vm400_vm1, %v238_v3, 0  ;;  %292 = vperm.xlu1 %1100, %v228_v16   ;;  %p1134_p2 = por %p1133_p1, %p1132_p0 }
  0x1d   : > { %985 = vmatpush3.bf16.msra.mxu0 %v402_v5 }
  0x1e   : > { %p1135_p3 = pnand %p1134_p2, %p1128_p13 }
  0x1f   : > { %297 = vperm.xlu0 %1099, %v229_v17  }
  0x20   : > { %987 = vmatmul.mubr.msk.bf16.vlgmr.msra.gmra.mrb[0].mxu0 %vm375_vm0, %v1106_v6  ;;  %302 = vperm.xlu1 %1100, %v230_v18  }
  0x21   : > { %990 = vmatprep.mubr.msk.bf16.mxu0 %vm375_vm0, %v1107_v8 }
  0x23   : > { %307 = vperm.xlu0 %1099, %v231_v21  }
  0x24   : > { %312 = vperm.xlu1 %1100, %v232_v22  }
  0x27   : > { %317 = vperm.xlu0 %1099, %v233_v23  }
  0x28   : > { %991 = vmatmul.mubr.msk.bf16.gmra.mrb[4].mxu0 %vm375_vm0, %v1108_v13  ;;  %322 = vperm.xlu1 %1100, %v234_v24  }
  0x29   : > { %994 = vmatprep.mubr.msk.bf16.mxu0 %vm375_vm0, %v1109_v14 }
  0x2b   : > { %327 = vperm.xlu0 %1099, %v235_v26  }
  0x2c   : > { %332 = vperm.xlu1 %1100, %v236_v27  }
  0x2f   : > { %1101 = vset.pattern.permute.xlu0 %v1190_v29 }
  0x30   : > { %995 = vmatmul.mubr.msk.bf16.gmra.mrb[8].mxu0 %vm375_vm0, %v1110_v19  ;;  %1102 = vset.pattern.permute.xlu1 %v1190_v29 }
  0x31   : > { %998 = vmatprep.mubr.msk.bf16.mxu0 %vm375_vm0, %v1111_v20  ;;  %546 = vperm.xlu1 %1102, %v222_v9  }
  0x32   : > { %542 = vperm.xlu0 %1101, %v1285_v4  }
  0x35   : > { %550 = vperm.xlu1 %1102, %v223_v7  }
  0x36   : > { %554 = vperm.xlu0 %1101, %v224_v10  }
  0x38   : > { %999 = vmatmul.mubr.msk.bf16.gmra.mrb[12].mxu0 %vm375_vm0, %v1112_v25 }
  0x39   : > { %558 = vperm.xlu1 %1102, %v225_v11  }
  0x3a   : > { %562 = vperm.xlu0 %1101, %v226_v12  }
  0x3d   : > { %566 = vperm.xlu1 %1102, %v227_v15  }
  0x3e   : > { %570 = vperm.xlu0 %1101, %v228_v16  }
  0x41   : > { %574 = vperm.xlu1 %1102, %v229_v17  }
  0x42   : > { %578 = vperm.xlu0 %1101, %v230_v18  }
  0x45   : > { %582 = vperm.xlu1 %1102, %v231_v21  }
  0x46   : > { %586 = vperm.xlu0 %1101, %v232_v22  }
  0x49   : > { %590 = vperm.xlu1 %1102, %v233_v23  }
  0x4a   : > { %594 = vperm.xlu0 %1101, %v234_v24  }
  0x4d   : > { %598 = vperm.xlu1 %1102, %v235_v26  }
  0x4e   : > { %602 = vperm.xlu0 %1101, %v236_v27  }
  0x8e   : > { %v258_v30 = vpop.permute.xlu0 %257 }
  0x8f   : > { %v268_v31 = vpop.permute.xlu1 %267 }
  0x92   : > { %v263_v32 = vpop.permute.xlu0 %262 }
  0x93   : > { %v273_v33 = vpop.permute.xlu1 %272 }
  0x96   : > { %v278_v34 = vpop.permute.xlu0 %277 }
  0x97   : > { %v283_v35 = vpop.permute.xlu1 %282 }
  0x9a   : > { %v288_v36 = vpop.permute.xlu0 %287 }
  0x9b   : > { %v293_v40 = vpop.permute.xlu1 %292 }
  0x9e   : > { %v298_v48 = vpop.permute.xlu0 %297 }
  0x9f   : > { %v303_v52 = vpop.permute.xlu1 %302 }
  0xa2   : > { %v308_v61 = vpop.permute.xlu0 %307 }
  0xa3   : > { %v313_v1 = vpop.permute.xlu1 %312 }
  0xa6   : > { %v318_v10 = vpop.permute.xlu0 %317 }
  0xa7   : > { %v323_v15 = vpop.permute.xlu1 %322 }
  0xaa   : > { %v328_v22 = vpop.permute.xlu0 %327 }
  0xab   : > { %v333_v27 = vpop.permute.xlu1 %332 }
  0xf3   : > { %v988_v37 = vpop.f32.mrb[0].mxu0 }
  0xf4   : > { %v447_v38 = vadd.f32 %v988_v37, %v268_v31  ;;  %v438_v39 = vpop.f32.mrb[1].mxu0 }
  0xf5   : > { %v439_v41 = vadd.f32 %v438_v39, %v258_v30  ;;  %v989_v42 = vpop.f32.mrb[2].mxu0  ;;  %v1114_v39 = vld [vmem:[%s1448_s2 + $0x8] sm:$0xff]  }
  0xf6   : > { %v450_v43 = vadd.f32 %v989_v42, %v273_v33  ;;  %v441_v44 = vpop.f32.mrb[3].mxu0  ;;  %v503_v46 = vmax.f32 %v447_v38, 0.0  ;;  %v1117_v42 = vld [vmem:[%s1448_s2 + $0x20] sm:$0xff]  }
  0xf7   : > { %v442_v45 = vadd.f32 %v441_v44, %v263_v32  ;;  %v501_v49 = vmax.f32 %v439_v41, 0.0  ;;  %v1116_v41 = vld [vmem:[%s1448_s2 + $0x18] sm:$0xff]   ;;  %v1119_v44 = vld [vmem:[%s1448_s2 + $0x30] sm:$0xff]  }
  0xf8   : > { %v504_v47 = vmax.f32 %v450_v43, 0.0  ;;  %v1118_v43 = vld [vmem:[%s1448_s2 + $0x28] sm:$0xff]  }
  0xf9   : > { %v502_v50 = vmax.f32 %v442_v45, 0.0  ;;  %v1120_v45 = vld [vmem:[%s1448_s2 + $0x38] sm:$0xff]  }
  0xfa   : > { %v534_v51 = vpack.c.bf16 %v504_v47, %v503_v46  ;;  %v1191_v46 = vmov 0.0   ;;  %v1193_v47 = vmov 2  }
  0xfb   : > { %v992_v53 = vpop.f32.mrb[4].mxu0  ;;  %v533_v54 = vpack.c.bf16 %v502_v50, %v501_v49  ;;  %1034 = vmatprep.subr.bf16.mxu0 %v1191_v46  ;;  %1050 = vmatprep.mubr.msk.bf16.mxu0 %vm1192_vm2, %v1191_v46  ;;  %v543_v49 = vpop.permute.xlu0 %542 }
  0xfc   : > { %v463_v55 = vadd.f32 %v992_v53, %v288_v36  ;;  %v454_v56 = vpop.f32.mrb[5].mxu0  ;;  %1103 = vset.pattern.permute.xlu1 %v1193_v47  ;;  %1104 = vset.pattern.permute.xlu0 %v1193_v47 }
  0xfd   : > { %v455_v57 = vadd.f32 %v454_v56, %v278_v34  ;;  %v993_v58 = vpop.f32.mrb[6].mxu0  ;;  %1002 = vmatprep.subr.bf16.mxu1 %v533_v54  ;;  %776 = vperm.xlu1 %1103, %v1285_v4  }
  0xfe   : > { %v466_v59 = vadd.f32 %v993_v58, %v293_v40  ;;  %v457_v60 = vpop.f32.mrb[7].mxu0  ;;  %1003 = vmatpush3.bf16.msra.mxu1 %v533_v54  ;;  %v507_v63 = vmax.f32 %v463_v55, 0.0  ;;  %v1115_v40 = vld [vmem:[%s1448_s2 + $0x10] sm:$0xff]  }
  0xff   : > { %v458_v62 = vadd.f32 %v457_v60, %v283_v35  ;;  %1004 = vmatprep.subr.bf16.mxu1 %v534_v51  ;;  %v505_v2 = vmax.f32 %v455_v57, 0.0 }
 0x100   : > { %v508_v0 = vmax.f32 %v466_v59, 0.0 }
 0x101   : > { %v506_v3 = vmax.f32 %v458_v62, 0.0 }
 0x102   : > { %v536_v5 = vpack.c.bf16 %v508_v0, %v507_v63  ;;  %1005 = vmatpush3.bf16.msra.mxu1 %v534_v51  ;;  %v555_v51 = vpop.permute.xlu0 %554 }
 0x103   : > { %v535_v6 = vpack.c.bf16 %v506_v3, %v505_v2  ;;  %v996_v7 = vpop.f32.mrb[8].mxu0 }
 0x104   : > { %v479_v8 = vadd.f32 %v996_v7, %v308_v61  ;;  %v470_v9 = vpop.f32.mrb[9].mxu0 }
 0x105   : > { %v471_v11 = vadd.f32 %v470_v9, %v298_v48  ;;  %v997_v12 = vpop.f32.mrb[10].mxu0  ;;  %1006 = vmatprep.subr.bf16.mxu1 %v535_v6  ;;  %v547_v48 = vpop.permute.xlu1 %546 }
 0x106   : > { %v482_v13 = vadd.f32 %v997_v12, %v313_v1  ;;  %v473_v14 = vpop.f32.mrb[11].mxu0  ;;  %1007 = vmatpush3.bf16.msra.mxu1 %v535_v6  ;;  %v511_v17 = vmax.f32 %v479_v8, 0.0  ;;  %v563_v53 = vpop.permute.xlu0 %562 }
 0x107   : > { %v474_v16 = vadd.f32 %v473_v14, %v303_v52  ;;  %1008 = vmatprep.subr.bf16.mxu1 %v536_v5  ;;  %v509_v19 = vmax.f32 %v471_v11, 0.0 }
 0x108   : > { %v512_v18 = vmax.f32 %v482_v13, 0.0 }
 0x109   : > { %v510_v20 = vmax.f32 %v474_v16, 0.0  ;;  %v551_v50 = vpop.permute.xlu1 %550 }
 0x10a   : > { %v538_v21 = vpack.c.bf16 %v512_v18, %v511_v17  ;;  %1009 = vmatpush3.bf16.msra.mxu1 %v536_v5  ;;  %v571_v58 = vpop.permute.xlu0 %570 }
 0x10b   : > { %v537_v23 = vpack.c.bf16 %v510_v20, %v509_v19  ;;  %v1000_v24 = vpop.f32.mrb[12].mxu0 }
 0x10c   : > { %v495_v25 = vadd.f32 %v1000_v24, %v328_v22  ;;  %v486_v26 = vpop.f32.mrb[13].mxu0 }
 0x10d   : > { %v487_v28 = vadd.f32 %v486_v26, %v318_v10  ;;  %v1001_v29 = vpop.f32.mrb[14].mxu0  ;;  %1010 = vmatprep.subr.bf16.mxu1 %v537_v23  ;;  %v559_v52 = vpop.permute.xlu1 %558 }
 0x10e   : > { %v498_v30 = vadd.f32 %v1001_v29, %v333_v27  ;;  %v489_v31 = vpop.f32.mrb[15].mxu0  ;;  %1011 = vmatpush3.bf16.msra.mxu1 %v537_v23  ;;  %v515_v33 = vmax.f32 %v495_v25, 0.0  ;;  %v579_v6 = vpop.permute.xlu0 %578 }
 0x10f   : > { %v490_v32 = vadd.f32 %v489_v31, %v323_v15  ;;  %1012 = vmatprep.subr.bf16.mxu1 %v538_v21  ;;  %v513_v35 = vmax.f32 %v487_v28, 0.0 }
 0x110   : > { %v516_v34 = vmax.f32 %v498_v30, 0.0 }
 0x111   : > { %v514_v36 = vmax.f32 %v490_v32, 0.0  ;;  %v567_v54 = vpop.permute.xlu1 %566 }
 0x112   : > { %v540_v37 = vpack.c.bf16 %v516_v34, %v515_v33  ;;  %1013 = vmatpush3.bf16.msra.mxu1 %v538_v21  ;;  %v587_v19 = vpop.permute.xlu0 %586 }
 0x113   : > { %v539_v38 = vpack.c.bf16 %v514_v36, %v513_v35 }
 0x115   : > { %1014 = vmatprep.subr.bf16.mxu1 %v539_v38  ;;  %v575_v2 = vpop.permute.xlu1 %574 }
 0x116   : > { %1015 = vmatpush3.bf16.msra.mxu1 %v539_v38  ;;  %v595_v32 = vpop.permute.xlu0 %594 }
 0x117   : > { %1016 = vmatprep.subr.bf16.mxu1 %v540_v37 }
 0x119   : > { %v583_v15 = vpop.permute.xlu1 %582 }
 0x11a   : > { %1017 = vmatpush3.bf16.msra.mxu1 %v540_v37 }
 0x11d   : > { %1019 = vmatmul.mubr.bf16.vlgmr.msra.gmra.mrb[0].mxu1 %v1114_v39  ;;  %v591_v27 = vpop.permute.xlu1 %590 }
 0x11e   : > { %1022 = vmatprep.mubr.bf16.mxu1 %v1115_v40 }
 0x121   : > { %v599_v39 = vpop.permute.xlu1 %598 }
 0x125   : > { %1023 = vmatmul.mubr.bf16.gmra.mrb[4].mxu1 %v1116_v41 }
 0x126   : > { %1026 = vmatprep.mubr.bf16.mxu1 %v1117_v42 }
 0x12d   : > { %1027 = vmatmul.mubr.bf16.gmra.mrb[8].mxu1 %v1118_v43 }
 0x12e   : > { %1030 = vmatprep.mubr.bf16.mxu1 %v1119_v44  ;;  %v603_v44 = vpop.permute.xlu0 %602 }
 0x135   : > { %1031 = vmatmul.mubr.bf16.gmra.mrb[12].mxu1 %v1120_v45 }
 0x1f0   : > { %v1020_v55 = vpop.f32.mrb[0].mxu1 }
 0x1f1   : > { %v696_v56 = vadd.f32 %v1020_v55, %v551_v50  ;;  %v687_v57 = vpop.f32.mrb[1].mxu1 }
 0x1f2   : > { %v688_v59 = vadd.f32 %v687_v57, %v543_v49  ;;  %v1021_v60 = vpop.f32.mrb[2].mxu1  ;;  %v766_v57 = vld [vmem:[%s1449_s3] sm:$0xf] }
 0x1f3   : > { %v699_v61 = vadd.f32 %v1021_v60, %v555_v51  ;;  %v690_v62 = vpop.f32.mrb[3].mxu1  ;;  %v752_v0 = vmax.f32 %v696_v56, 0.0  ;;  %v777_v60 = vpop.permute.xlu1 %776 }
 0x1f4   : > { %v691_v63 = vadd.f32 %v690_v62, %v547_v48  ;;  %v750_v4 = vmax.f32 %v688_v59, 0.0 }
 0x1f5   : > { %v753_v1 = vmax.f32 %v699_v61, 0.0 }
 0x1f6   : > { %v751_v3 = vmax.f32 %v691_v63, 0.0 }
 0x1f7   : > { %v768_v5 = vpack.c.bf16 %v753_v1, %v752_v0 }
 0x1f8   : > { %v767_v7 = vpack.c.bf16 %v751_v3, %v750_v4  ;;  %v1024_v8 = vpop.f32.mrb[4].mxu1 }
 0x1f9   : > { %v712_v9 = vadd.f32 %v1024_v8, %v567_v54  ;;  %v703_v10 = vpop.f32.mrb[5].mxu1 }
 0x1fa   : > { %v704_v11 = vadd.f32 %v703_v10, %v559_v52  ;;  %v1025_v12 = vpop.f32.mrb[6].mxu1  ;;  %1035 = vmatpush3.bf16.msra.mxu0 %v767_v7 }
 0x1fb   : > { %v715_v13 = vadd.f32 %v1025_v12, %v571_v58  ;;  %v706_v14 = vpop.f32.mrb[7].mxu1  ;;  %1036 = vmatprep.subr.bf16.mxu0 %v1191_v46  ;;  %v756_v17 = vmax.f32 %v712_v9, 0.0  ;;  %v819_v58 = vlaneseq }
 0x1fc   : > { %v707_v16 = vadd.f32 %v706_v14, %v563_v53  ;;  %v754_v20 = vmax.f32 %v704_v11, 0.0 }
 0x1fd   : > { %v757_v18 = vmax.f32 %v715_v13, 0.0  ;;  %v820_v59 = vshrl.u32 %v819_v58, 7 }
 0x1fe   : > { %v755_v21 = vmax.f32 %v707_v16, 0.0  ;;  %1037 = vmatpush3.bf16.msra.mxu0 %v768_v5 }
 0x1ff   : > { %v770_v22 = vpack.c.bf16 %v757_v18, %v756_v17  ;;  %1038 = vmatprep.subr.bf16.mxu0 %v1191_v46  ;;  %vm821_vm3 = vcmp.lt.s32.totalorder %v820_v59, 2  ;;  %vm840_vm4 = vcmp.eq.s32.totalorder %v820_v59, 2 }
 0x200   : > { %v769_v23 = vpack.c.bf16 %v755_v21, %v754_v20  ;;  %v1028_v24 = vpop.f32.mrb[8].mxu1 }
 0x201   : > { %v728_v25 = vadd.f32 %v1028_v24, %v583_v15  ;;  %v719_v26 = vpop.f32.mrb[9].mxu1 }
 0x202   : > { %v720_v28 = vadd.f32 %v719_v26, %v575_v2  ;;  %v1029_v29 = vpop.f32.mrb[10].mxu1  ;;  %1039 = vmatpush3.bf16.msra.mxu0 %v769_v23 }
 0x203   : > { %v731_v30 = vadd.f32 %v1029_v29, %v587_v19  ;;  %v722_v31 = vpop.f32.mrb[11].mxu1  ;;  %1040 = vmatprep.subr.bf16.mxu0 %v1191_v46  ;;  %v760_v34 = vmax.f32 %v728_v25, 0.0 }
 0x204   : > { %v723_v33 = vadd.f32 %v722_v31, %v579_v6  ;;  %v758_v36 = vmax.f32 %v720_v28, 0.0 }
 0x205   : > { %v761_v35 = vmax.f32 %v731_v30, 0.0 }
 0x206   : > { %v759_v37 = vmax.f32 %v723_v33, 0.0  ;;  %1041 = vmatpush3.bf16.msra.mxu0 %v770_v22 }
 0x207   : > { %v772_v38 = vpack.c.bf16 %v761_v35, %v760_v34  ;;  %1042 = vmatprep.subr.bf16.mxu0 %v1191_v46 }
 0x208   : > { %v771_v40 = vpack.c.bf16 %v759_v37, %v758_v36  ;;  %v1032_v41 = vpop.f32.mrb[12].mxu1 }
 0x209   : > { %v744_v42 = vadd.f32 %v1032_v41, %v599_v39  ;;  %v735_v43 = vpop.f32.mrb[13].mxu1 }
 0x20a   : > { %v736_v45 = vadd.f32 %v735_v43, %v591_v27  ;;  %v1033_v47 = vpop.f32.mrb[14].mxu1  ;;  %1043 = vmatpush3.bf16.msra.mxu0 %v771_v40 }
 0x20b   : > { %v747_v48 = vadd.f32 %v1033_v47, %v603_v44  ;;  %v738_v49 = vpop.f32.mrb[15].mxu1  ;;  %1044 = vmatprep.subr.bf16.mxu0 %v1191_v46  ;;  %v764_v51 = vmax.f32 %v744_v42, 0.0 }
 0x20c   : > { %v739_v50 = vadd.f32 %v738_v49, %v595_v32  ;;  %v762_v53 = vmax.f32 %v736_v45, 0.0 }
 0x20d   : > { %v765_v52 = vmax.f32 %v747_v48, 0.0 }
 0x20e   : > { %v763_v54 = vmax.f32 %v739_v50, 0.0  ;;  %1045 = vmatpush3.bf16.msra.mxu0 %v772_v38 }
 0x20f   : > { %v774_v55 = vpack.c.bf16 %v765_v52, %v764_v51  ;;  %1046 = vmatprep.subr.bf16.mxu0 %v1191_v46 }
 0x210   : > { %v773_v56 = vpack.c.bf16 %v763_v54, %v762_v53 }
 0x212   : > { %1047 = vmatpush3.bf16.msra.mxu0 %v773_v56 }
 0x213   : > { %1048 = vmatprep.subr.bf16.mxu0 %v1191_v46 }
 0x216   : > { %1049 = vmatpush3.bf16.msra.mxu0 %v774_v55 }
 0x219   : > { %1051 = vmatmul.mubr.bf16.vlgmr.msra.gmra.mrb[16].mxu0 %v766_v57 }
 0x2ec   : > { %v813_v61 = vpop.f32.mrb[16].mxu0 }
 0x2ed   : > { %v814_v62 = vadd.f32 %v813_v61, %v777_v60  ;;  %v1052_v63 = vpop.f32.mrb[17].mxu0 }
 0x2ee   : > { %v816_v0 = vpop.f32.mrb[18].mxu0 }
 0x2ef   : > { %v822_v1 = vsel %vm821_vm3, %v814_v62, -inf  ;;  %v1053_v2 = vpop.f32.mrb[19].mxu0 }
 0x2f0   : > { %v823_v4 = vrot.slane %v822_v1, 4 }
 0x2f2   : > { %v824_v3 = vmax.f32 %v822_v1, %v823_v4 }
 0x2f4   : > { %v825_v46 = vrot.slane %v824_v3, 2 }
 0x2f6   : > { %v826_v5 = vmax.f32 %v824_v3, %v825_v46 }
 0x2f8   : > { %v827_v6 = vrot.slane %v826_v5, 1 }
 0x2fa   : > { %v828_v7 = vmax.f32 %v826_v5, %v827_v6 }
 0x2fc   : > { %v829_v8 = vsub.f32 %v822_v1, %v828_v7 }
 0x2fe   : > { %v830_v9 = vmul.f32 1.442695, %v829_v8 }
 0x300   : > { %1121 = vpow2.f32 %v830_v9 }
 0x30a   : > { %v1122_v10 = vpop.eup %1121 }
 0x30b   : > { %v832_v11 = vrot.slane %v1122_v10, 4 }
 0x30d   : > { %v833_v12 = vadd.f32 %v1122_v10, %v832_v11 }
 0x30f   : > { %v834_v13 = vrot.slane %v833_v12, 2 }
 0x311   : > { %v835_v14 = vadd.f32 %v834_v13, %v833_v12 }
 0x313   : > { %v836_v15 = vrot.slane %v835_v14, 1 }
 0x315   : > { %v837_v16 = vadd.f32 %v836_v15, %v835_v14 }
 0x317   : > { %1123 = vrcp.f32 %v837_v16 }
 0x321   : > { %v1124_v17 = vpop.eup %1123 }
 0x322   : > { %v839_v18 = vmul.f32 %v1124_v17, %v1122_v10 }
 0x324   : > { %v841_v19 = vsel %vm840_vm4, %v814_v62, %v839_v18 }
 0x325   : > { %842 = vst [vmem:[%s215_s15] sm:$0xff] %v841_v19 }
 0x326   : > { %1138 = shalt.err (!%p1135_p3)
}
 0x327   : > { %s1139_s8 = scalar_lea.hbm %s1404_s25, 128  ;;  %s1143_s11 = scalar_lea.hbm %s1451_s5, 256 }
 0x328   : > { %p1140_p4 = scmp.ne.s32.totalorder %s1404_s25, %s1139_s8  ;;  %p1144_p9 = scmp.lt.u32.totalorder %s1404_s25, %s1451_s5 }
 0x329   : > { %p1145_p10 = scmp.lt.u32.totalorder %s1143_s11, %s1139_s8  ;;  %p1147_p12 = scmp.lt.u32.totalorder %s1139_s8, %s1404_s25 }
 0x32a   : > { %p1141_p7 = pnand %p1140_p4, %p1263_p5 }
 0x32b   : > { %p1146_p11 = por %p1145_p10, %p1144_p9 }
 0x32c   : > { %p1142_p8 = pneg %p1141_p7 }
 0x32d   : > { %p1148_p13 = por %p1147_p12, %p1146_p11 }
 0x32f   : > { %p1149_p0 = pnand %p1148_p13, %p1142_p8 }
 0x331   : > { %1152 = shalt.err (!%p1149_p0)
}
 0x332   : > { %1055 = dma.vmem_to_hbm [thread:$0]  (%p1263_p5), %s1406_s16, 128, %s1404_s25, %s844_s26  }
 0x333 PF: > { %p1061_p1 = scmp.ge.s32.totalorder %s1187_s21, 2  ;;  %s869_s14 = sand.u32 1, %s1175_s18  }
 0x334   : > { %s870_s15 = scalar_lea.sflag [#allocation3], %s869_s14 }
 0x335   : > { %p1058_p2 = pnand %p1061_p1, %p1267_p6 }
 0x337   : > { %1170 = dma.done.wait (!%p1058_p2), %s870_s15, 128  }
 0x338   : > { %1172 = vsyncadd (!%p1058_p2), %s870_s15, 4294967168  ;;  %p15_p3 = scmp.ge.s32.totalorder %s1250_s24, 4   ;;  %s1454_s18 = smov %s1179_s19 }
 0x339   : > { %s1455_s19 = smov %s1183_s20  ;;  %s1456_s20 = smov %s1261_s27 }
 0x33a   : > { %s1457_s21 = smov %s1250_s24  ;;  %17 = sbr.rel (!%p15_p3) target bundleno = 3 (0x3), region = 75 }
 0x341   :  { %875 = vsyncpa [#allocation3], 1 }
 0x342   :  { %877 = vsyncpa [#allocation3 + $0x1], 1 }

</bundles_post_ra>
